<compile_context>
chip_gen: v7x
topology: tpu7x:2x2x1
jax: 0.10.0
libtpu: 0.0.40
codegen_flags: <defaults>
</compile_context>

<pallas_src>
import functools

import jax
import jax.numpy as jnp
import numpy as np
from jax import lax
from jax.experimental import pallas as pl
from jax.experimental.pallas import tpu as pltpu


def _round_up(x, m):
    return ((x + m - 1) // m) * m


def _vmem_cap_bytes():
    """Physical VMEM minus headroom; fallback is safe on all generations."""
    try:
        phys = int(pltpu.get_tpu_info().vmem_capacity_bytes)
        return max(32 << 20, min(phys - (16 << 20), 100 << 20))
    except Exception:
        return 48 << 20  # v7x has 64 MiB physical -> leave 16 MiB headroom


def _epilogue(feat_f32, no_imgnorm, use_abs):
    # feat_f32: (tm, embed) f32.  l2norm over dim=1 via rsqrt (EUP) * mul (VPU).
    if not no_imgnorm:
        sumsq = jnp.sum(feat_f32 * feat_f32, axis=1, keepdims=True)
        feat_f32 = feat_f32 * lax.rsqrt(sumsq)
    if use_abs:
        feat_f32 = jnp.abs(feat_f32)
    return feat_f32


def _fc_l2norm_kernel(x_ref, w_ref, b_ref, o_ref, *, no_imgnorm, use_abs):
    # x_ref: (tm, K), w_ref: (K, N) bf16, b_ref: (1, N) f32, o_ref: (tm, N)
    x = x_ref[...]
    if x.dtype != jnp.bfloat16:          # static check; VPU cast, hidden by MXU
        x = x.astype(jnp.bfloat16)
    feat = jnp.dot(x, w_ref[...], preferred_element_type=jnp.float32) + b_ref[...]
    o_ref[...] = _epilogue(feat, no_imgnorm, use_abs).astype(o_ref.dtype)


def _fc_l2norm_ksplit_kernel(x_ref, w_ref, b_ref, o_ref, acc_ref, *,
                             img_dim, tk, no_imgnorm, use_abs):
    # Grid = (row_tiles, k_tiles); K is last so the output block / accumulator
    # stays resident across the reduction.
    k = pl.program_id(1)

    @pl.when(k == 0)
    def _():
        acc_ref[...] = jnp.zeros_like(acc_ref)

    x = x_ref[...]
    if x.dtype != jnp.bfloat16:
        x = x.astype(jnp.bfloat16)
    w = w_ref[...]

    if img_dim % tk != 0:
        # Ragged last K block: mask both operands so stale data in the padded
        # region of the edge tiles can never reach the accumulator.
        kx = k * tk + lax.broadcasted_iota(jnp.int32, (1, tk), 1)
        kw = k * tk + lax.broadcasted_iota(jnp.int32, (tk, 1), 0)
        x = jnp.where(kx < img_dim, x, 0)
        w = jnp.where(kw < img_dim, w, 0)

    acc_ref[...] += jnp.dot(x, w, preferred_element_type=jnp.float32)

    @pl.when(k == pl.num_programs(1) - 1)
    def _():
        feat = acc_ref[...] + b_ref[...]
        o_ref[...] = _epilogue(feat, no_imgnorm, use_abs).astype(o_ref.dtype)


def encoder_image_precomp(images, weight_t, bias, *, tm=512, tk=512,
                          out_dtype=jnp.float32, no_imgnorm=False,
                          use_abs=False, force_ksplit=False):
    """images: (B, img_dim); weight_t: (img_dim, embed) [bf16 preferred];
    bias: (embed,)."""
    B, img_dim = images.shape
    kdim, embed = weight_t.shape
    assert kdim == img_dim

    # Weight lives in HBM as bf16 (halves its DMA + resident VMEM).
    w = weight_t if weight_t.dtype == jnp.bfloat16 else weight_t.astype(jnp.bfloat16)
    b2 = bias.astype(jnp.float32).reshape(1, embed)
    x = images  # cast to bf16 happens inside the kernel if needed

    x_isz = jnp.dtype(x.dtype).itemsize
    o_isz = jnp.dtype(out_dtype).itemsize

    # Balanced row tiles: >=2 tiles when B is large enough (v7x has 2 TCs),
    # 16-row alignment for bf16 sublane packing.
    num_tiles = pl.cdiv(B, tm)
    if num_tiles == 1 and B >= 32:
        num_tiles = 2
    tm_eff = min(_round_up(pl.cdiv(B, num_tiles), 16), _round_up(B, 16))
    grid_m = pl.cdiv(B, tm_eff)

    cap = _vmem_cap_bytes()
    cost = pl.CostEstimate(
        flops=2 * B * img_dim * embed,
        transcendentals=0 if no_imgnorm else B,
        bytes_accessed=B * img_dim * x_isz + img_dim * embed * 2
        + embed * 4 + B * embed * o_isz,
    )

    single_pass_bytes = (
        img_dim * embed * 2            # weight (bf16, single-buffered)
        + embed * 4                    # bias
        + 2 * tm_eff * img_dim * x_isz # x tiles (double-buffered)
        + 2 * tm_eff * embed * o_isz   # out tiles (double-buffered)
    ) + (4 << 20)                      # slack for Mosaic internals

    if not force_ksplit and single_pass_bytes <= cap:
        # ---- Single-pass path: whole K resident, weight read once. ----
        vmem_bytes = int(min(max(single_pass_bytes, 16 << 20), cap))
        kernel = functools.partial(_fc_l2norm_kernel,
                                   no_imgnorm=no_imgnorm, use_abs=use_abs)
        return pl.pallas_call(
            kernel,
            out_shape=jax.ShapeDtypeStruct((B, embed), out_dtype),
            grid_spec=pltpu.PrefetchScalarGridSpec(
                num_scalar_prefetch=0,
                grid=(grid_m,),
                in_specs=[
                    pl.BlockSpec((tm_eff, img_dim), lambda i: (i, 0)),
                    pl.BlockSpec((img_dim, embed), lambda i: (0, 0),
                                 pipeline_mode=pl.Buffered(1)),
                    pl.BlockSpec((1, embed), lambda i: (0, 0),
                                 pipeline_mode=pl.Buffered(1)),
                ],
                out_specs=pl.BlockSpec((tm_eff, embed), lambda i: (i, 0)),
            ),
            compiler_params=pltpu.CompilerParams(
                dimension_semantics=("parallel",),
                vmem_limit_bytes=vmem_bytes,
            ),
            cost_estimate=cost,
        )(x, w, b2)

    # ---- K-split path: keeps large fc layers inside v7x's 64 MiB VMEM. ----
    if img_dim <= tk:
        tk_eff = img_dim
    else:
        tk_eff = _round_up(tk, 128)
    grid_k = pl.cdiv(img_dim, tk_eff)

    ksplit_bytes = (
        2 * tk_eff * embed * 2          # weight tiles (double-buffered, bf16)
        + embed * 4
        + 2 * tm_eff * tk_eff * x_isz   # x tiles
        + 2 * tm_eff * embed * o_isz    # out tiles
        + tm_eff * embed * 4            # f32 accumulator scratch
    ) + (4 << 20)
    vmem_bytes = int(min(max(ksplit_bytes, 16 << 20), cap))

    kernel = functools.partial(_fc_l2norm_ksplit_kernel,
                               img_dim=img_dim, tk=tk_eff,
                               no_imgnorm=no_imgnorm, use_abs=use_abs)
    return pl.pallas_call(
        kernel,
        out_shape=jax.ShapeDtypeStruct((B, embed), out_dtype),
        grid_spec=pltpu.PrefetchScalarGridSpec(
            num_scalar_prefetch=0,
            grid=(grid_m, grid_k),   # K last -> accumulator stays resident
            in_specs=[
                pl.BlockSpec((tm_eff, tk_eff), lambda i, k: (i, k)),
                pl.BlockSpec((tk_eff, embed), lambda i, k: (k, 0)),
                pl.BlockSpec((1, embed), lambda i, k: (0, 0),
                             pipeline_mode=pl.Buffered(1)),
            ],
            out_specs=pl.BlockSpec((tm_eff, embed), lambda i, k: (i, 0)),
            scratch_shapes=[pltpu.VMEM((tm_eff, embed), jnp.float32)],
        ),
        compiler_params=pltpu.CompilerParams(
            dimension_semantics=("parallel", "arbitrary"),
            vmem_limit_bytes=vmem_bytes,
        ),
        cost_estimate=cost,
    )(x, w, b2)
    # TODO(synk): load_state_dict / init_weights are host-side parameter
    # plumbing and have no kernel equivalent (handled in the harness below).


if __name__ == "__main__":
    key = jax.random.PRNGKey(0)
    k_x1, k_w1, k_x2, k_w2 = jax.random.split(key, 4)

    def xavier_weight(k, img_dim, embed):
        # torch weight is (embed, img_dim); keep it pre-transposed.
        r = np.sqrt(6.0) / np.sqrt(img_dim + embed)
        return jax.random.uniform(k, (img_dim, embed), minval=-r, maxval=r,
                                  dtype=jnp.float32)

    def reference_bf16(images, weight_t, bias):
        # Same numerics as the kernel: bf16 operands, f32 accumulation,
        # f32 l2norm epilogue.
        feat = jnp.dot(images.astype(jnp.bfloat16),
                       weight_t.astype(jnp.bfloat16),
                       preferred_element_type=jnp.float32) + bias
        return feat * lax.rsqrt(jnp.sum(feat * feat, axis=1, keepdims=True))

    def reference_f32(images, weight_t, bias):
        # Exact PyTorch-module semantics (f32 matmul, sqrt-divide l2norm).
        feat = images @ weight_t + bias
        return feat / jnp.sqrt(jnp.sum(feat ** 2, axis=1, keepdims=True))

    # --- Case 1: single-pass path; 2 balanced row tiles + ragged edge ---
    B1, D1, E1 = 300, 128, 256
    w1 = xavier_weight(k_w1, D1, E1)
    b1 = jnp.zeros((E1,), jnp.float32)
    x1 = jax.random.normal(k_x1, (B1, D1), dtype=jnp.float32)
    out1 = jax.block_until_ready(
        encoder_image_precomp(x1, w1.astype(jnp.bfloat16), b1))
    np.testing.assert_allclose(np.asarray(out1),
                               np.asarray(reference_bf16(x1, w1, b1)),
                               rtol=1e-3, atol=1e-3)
    np.testing.assert_allclose(np.asarray(out1),
                               np.asarray(reference_f32(x1, w1, b1)),
                               rtol=5e-2, atol=5e-3)

    # --- Case 2: K-split accumulator path (ragged K and ragged rows) ---
    B2, D2, E2 = 100, 192, 256
    w2 = xavier_weight(k_w2, D2, E2)
    b2 = jnp.zeros((E2,), jnp.float32)
    x2 = jax.random.normal(k_x2, (B2, D2), dtype=jnp.float32)
    out2 = jax.block_until_ready(
        encoder_image_precomp(x2.astype(jnp.bfloat16), w2.astype(jnp.bfloat16),
                              b2, tk=128, force_ksplit=True))
    np.testing.assert_allclose(np.asarray(out2),
                               np.asarray(reference_bf16(x2, w2, b2)),
                               rtol=1e-3, atol=1e-3)

    print("KERNEL_OK")
</pallas_src>

<mosaic_0001>
module attributes {stable_mosaic.version = 11 : i64} {
  func.func @_fc_l2norm_kernel(%arg0: i32, %arg1: memref<160x128xf32, #tpu.memory_space<vmem>>, %arg2: memref<128x256xbf16, #tpu.memory_space<vmem>>, %arg3: memref<1x256xf32, #tpu.memory_space<vmem>>, %arg4: memref<160x256xf32, #tpu.memory_space<vmem>>) attributes {dimension_semantics = [#tpu.dimension_semantics<parallel>], iteration_bounds = array<i64: 2>, scalar_prefetch = 0 : i64, scratch_operands = 0 : i64, tpu.core_type = #tpu.core_type<tc>, window_params = [{transform_indices = @transform_0, window_bounds = array<i64: 160, 128>}, {pipeline_mode = #tpu.pipeline_mode<synchronous>, transform_indices = @transform_1, window_bounds = array<i64: 128, 256>}, {pipeline_mode = #tpu.pipeline_mode<synchronous>, transform_indices = @transform_2, window_bounds = array<i64: 1, 256>}, {transform_indices = @transform_3, window_bounds = array<i64: 160, 256>}]} {
    %c0 = arith.constant 0 : index
    %c0_0 = arith.constant 0 : index
    %0 = vector.load %arg1[%c0, %c0_0] : memref<160x128xf32, #tpu.memory_space<vmem>>, vector<160x128xf32>
    %1 = arith.truncf %0 : vector<160x128xf32> to vector<160x128xbf16>
    %c0_1 = arith.constant 0 : index
    %c0_2 = arith.constant 0 : index
    %2 = vector.load %arg2[%c0_1, %c0_2] : memref<128x256xbf16, #tpu.memory_space<vmem>>, vector<128x256xbf16>
    %cst = arith.constant dense<0.000000e+00> : vector<160x256xf32>
    %3 = tpu.matmul %1, %2, %cst {dimension_numbers = #tpu.dot_dimension_numbers<[1], [0], [0], [1], [0, 0, 1, 1], [], []>} : vector<160x128xbf16>, vector<128x256xbf16>, vector<160x256xf32> -> vector<160x256xf32>
    %c0_3 = arith.constant 0 : index
    %c0_4 = arith.constant 0 : index
    %4 = vector.load %arg3[%c0_3, %c0_4] : memref<1x256xf32, #tpu.memory_space<vmem>>, vector<1x256xf32>
    %5 = vector.broadcast %4 : vector<1x256xf32> to vector<160x256xf32>
    %6 = arith.addf %3, %5 : vector<160x256xf32>
    %7 = arith.mulf %6, %6 : vector<160x256xf32>
    %cst_5 = arith.constant dense<0.000000e+00> : vector<160xf32>
    %8 = vector.multi_reduction <add>, %7, %cst_5 [1] : vector<160x256xf32> to vector<160xf32>
    %9 = vector.shape_cast %8 : vector<160xf32> to vector<160x1xf32>
    %10 = math.rsqrt %9 : vector<160x1xf32>
    %11 = vector.broadcast %10 : vector<160x1xf32> to vector<160x256xf32>
    %12 = arith.mulf %6, %11 : vector<160x256xf32>
    %c0_6 = arith.constant 0 : index
    %c0_7 = arith.constant 0 : index
    %13 = vector.load %arg4[%c0_6, %c0_7] : memref<160x256xf32, #tpu.memory_space<vmem>>, vector<160x256xf32>
    tpu.vector_store %arg4[%c0_6, %c0_7], %12 {strides = array<i32>} : memref<160x256xf32, #tpu.memory_space<vmem>>, vector<160x256xf32>,
    return
  }
  func.func @transform_0(%arg0: i32) -> (i32, i32) {
    %c0_i32 = arith.constant 0 : i32
    %c0_i32_0 = arith.constant 0 : i32
    return %arg0, %c0_i32 : i32, i32
  }
  func.func @transform_1(%arg0: i32) -> (i32, i32) {
    %c0_i32 = arith.constant 0 : i32
    %c0_i32_0 = arith.constant 0 : i32
    %c0_i32_1 = arith.constant 0 : i32
    return %c0_i32, %c0_i32_0 : i32, i32
  }
  func.func @transform_2(%arg0: i32) -> (i32, i32) {
    %c0_i32 = arith.constant 0 : i32
    %c0_i32_0 = arith.constant 0 : i32
    %c0_i32_1 = arith.constant 0 : i32
    return %c0_i32, %c0_i32_0 : i32, i32
  }
  func.func @transform_3(%arg0: i32) -> (i32, i32) {
    %c0_i32 = arith.constant 0 : i32
    %c0_i32_0 = arith.constant 0 : i32
    return %arg0, %c0_i32 : i32, i32
  }
}

</mosaic_0001>

<bundles_post_ra>
// kernel: tpu_custom_call.1
= control target key start
LH: loop header
LB: loop body
LE: loop exit
PB: predicated region body
PF: predicated region fallthrough
CT: control target
= control target key end

     0   :  { %8 = vsyncpa [#allocation3], 0  ;;  %s1672_s0 = inlined_call_operand.hbm [shape: f32[300,128], index: 0, kind: input, shape index: {}]   ;;  %s1673_s1 = inlined_call_operand.hbm [shape: bf16[128,256], index: 1, kind: input, shape index: {}]   ;;  %s1674_s2 = inlined_call_operand.vmem [shape: f32[1,256], index: 2, kind: input, shape index: {}]   ;;  %s1675_s3 = inlined_call_operand.hbm [shape: f32[300,256], index: 3, kind: output, shape index: {}]  }
   0x1   :  { %10 = vsyncpa [#allocation3 + $0x1], 0 }
   0x2   :  { %11 = vsyncpa [#allocation6], 0 }
   0x3   :  { %12 = vsyncpa [#allocation4], 0 }
   0x4   :  { %14 = vsyncpa [#allocation4 + $0x1], 0  ;;  %s1137_s12 = smov 0   ;;  %s1139_s13 = smov 0  }
   0x5   :  { %s1141_s14 = smov 0   ;;  %s1143_s15 = smov 0  }
   0x6 LB: > { %s1158_s16 = sadd.s32 4294967295, %s1105_s15   ;;  %s798_s17 = sadd.s32 4294967294, %s1105_s15   ;;  %s1105_s15 = sphi %s1143_s15, %s1695_s15   ;;  %s1101_s14 = sphi %s1141_s14, %s1694_s14   ;;  %s1097_s13 = sphi %s1139_s13, %s1693_s13   ;;  %s1093_s12 = sphi %s1137_s12, %s1692_s12  }
   0x7   : > { %s1162_s18 = sadd.s32 1, %s1105_s15   ;;  %s27_s19 = sadd.s32 1, %s1101_s14 }
   0x8   : > { %s24_s20 = ssub.s32 %s1105_s15, %s1162_s18  ;;  %p34_p0 = scmp.ne.s32.totalorder %s1101_s14, %s1097_s13 }
   0x9   : > { %p25_p1 = scmp.eq.s32.totalorder %s24_s20, 0  ;;  %p35_p2 = scmp.eq.s32.totalorder %s1105_s15, 0 }
   0xa   : > { %p40_p3 = scmp.ne.s32.totalorder %s1097_s13, %s1093_s12  ;;  %p1676_p4 = scmp.eq.s32.totalorder %s1158_s16, 0 }
   0xb   : > { %s1174_s21 = scalar_select %p25_p1, %s1101_s14, %s27_s19  }
   0xc   : > { %p1176_p5 = por %p35_p2, %p34_p0  ;;  %p1182_p6 = por %p1676_p4, %p40_p3 }
   0xd   : > { %p106_p7 = scmp.eq.s32.totalorder %s1158_s16, 1  ;;  %p112_p8 = scmp.eq.s32.totalorder %s798_s17, 1 }
   0xe   : > { %s1679_s22 = scalar_select %p1176_p5, 1, 0 }
   0xf   : > { %s1680_s23 = scalar_select %p1182_p6, 1, 0 }
  0x10   : > { %p799_p9 = scmp.ge.s32.totalorder %s1105_s15, 1  ;;  %p119_p10 = scmp.lt.s32.totalorder %s1105_s15, 3 }
  0x11   : > { %p1189_p11 = por %p106_p7, %p34_p0  ;;  %p1193_p12 = por %p112_p8, %p40_p3 }
  0x12   : > { %p1197_p13 = pnand %p799_p9, %p119_p10  ;;  %s1107_s27 = smov [#allocation5]  }
  0x13   : > { %s1681_s24 = scalar_select %p1189_p11, 1, 0 }
  0x14   : > { %s1682_s25 = scalar_select %p1193_p12, 1, 0 }
  0x15   : > { %s1683_s26 = scalar_select %p1197_p13, 1, 0 }
  0x16   : > { %p864_p1 = pneg %p1197_p13  ;;  %s131_s28 = sshll.u32 %s1107_s27, 4  ;;  %s132_s28 = int_to_ptr.vmem [resolvable:$true] %s131_s28 }
  0x17   : > { %s979_s5 = scalar_lea.hbm %s1673_s1, 2048 }
  0x18   : > { %p1205_p2 = pnand %p864_p1, %p1676_p4  ;;  %p980_p0 = scmp.ne.s32.totalorder %s1673_s1, %s979_s5 }
  0x19   : > { %p986_p9 = scmp.lt.u32.totalorder %s979_s5, %s1673_s1 }
  0x1a   : > { %p981_p3 = pneg %p1205_p2 }
  0x1c   : > { %p982_p7 = pnand %p981_p3, %p980_p0 }
  0x1e   : > { %p983_p8 = pneg %p982_p7 }
  0x20   : > { %p988_p10 = pnand %p986_p9, %p983_p8 }
  0x22   : > { %991 = shalt.err (!%p988_p10)
}
  0x23   : > { %s992_s10 = scalar_lea.vmem %s132_s28, 2048  ;;  %p1000_p11 = scmp.lt.s32.totalorder %s132_s28, %s132_s28 }
  0x24   : > { %p993_p1 = scmp.ne.s32.totalorder %s132_s28, %s992_s10  ;;  %p1001_p6 = scmp.lt.s32.totalorder %s992_s10, %s992_s10 }
  0x26   : > { %p995_p4 = pnand %p993_p1, %p981_p3  ;;  %p1002_p13 = por %p1001_p6, %p1000_p11 }
  0x28   : > { %p996_p12 = pneg %p995_p4 }
  0x2a   : > { %p1003_p5 = pnand %p1002_p13, %p996_p12 }
  0x2c   : > { %1006 = shalt.err (!%p1003_p5)
}
  0x2d   : > { %s1108_s11 = smov 128   ;;  %s1109_s17 = smov 8  }
  0x2e   : > { %867 = dma.hbm_to_vmem [thread:$0]  (!%p1205_p2), %s1673_s1, 2048, %s132_s28, [#allocation6], %s1108_s11, %s1108_s11, %s1109_s17  }
  0x2f   : > { %p801_p0 = scmp.ge.s32.totalorder %s1105_s15, 2 }
  0x30   : > { %p1685_p4 = scmp.ne.s32.totalorder (!%p801_p0), %s1679_s22, 0 }
  0x31   : > { %144 = sbr.rel (%p801_p0) target bundleno = 91 (0x5b), region = 24 }
  0x38   : > { %147 = sbr.rel (!%p1685_p4) target bundleno = 91 (0x5b), region = 28  ;;  %s148_s27 = sand.u32 (%p1685_p4), 1, %s1101_s14  }
  0x39   : > { %s153_s30 = smul.u32 (%p1685_p4), 20, %s1105_s15  ;;  %s1235_s6 = scalar_lea.sflag (%p1685_p4), [#allocation3], %s148_s27 }
  0x3a   : > { %s855_s4 = smul.u32 (%p1685_p4), 160, %s148_s27 }
  0x3b   : > { %s154_s5 = ssub.s32 (%p1685_p4), 38, %s153_s30 }
  0x3c   : > { %p155_p5 = scmp.lt.s32.totalorder (%p1685_p4), %s154_s5, 20  ;;  %s152_s7 = scalar_lea.vmem (%p1685_p4), [#allocation2], %s855_s4 }
  0x3f   : > { %s1697_s5 = smov (!%p155_p5, %s154_s5), 20 }
  0x40   : > { %s1232_s29 = sshll.u32 %s1697_s5, 7 }
  0x41   : > { %s159_s28 = ssub.s32 2560, %s1232_s29 }
  0x42   : > { %160 = vsyncadd %s1235_s6, %s159_s28  ;;  %p803_p6 = scmp.ne.s32.totalorder %s1232_s29, 0  ;;  %s834_s22 = smul.u32 2560, %s1105_s15 }
  0x43   : > { %s165_s8 = sshll.u32 %s152_s7, 4  ;;  %s1011_s27 = scalar_lea.hbm %s1672_s0, 4864  ;;  %s1245_s8 = int_to_ptr.vmem [resolvable:$true] %s165_s8 }
  0x44   : > { %s1243_s11 = scalar_lea.hbm %s1672_s0, %s834_s22 }
  0x45   : > { %s1007_s17 = scalar_lea.hbm %s1243_s11, %s1232_s29  ;;  %p1012_p2 = scmp.lt.u32.totalorder %s1243_s11, %s1672_s0 }
  0x46   : > { %p1008_p11 = scmp.ne.s32.totalorder %s1243_s11, %s1007_s17  ;;  %p1013_p3 = scmp.lt.u32.totalorder %s1011_s27, %s1007_s17 }
  0x47   : > { %p1015_p8 = scmp.lt.u32.totalorder %s1007_s17, %s1243_s11 }
  0x48   : > { %p1009_p12 = pnand %p1008_p11, %p803_p6  ;;  %p1014_p7 = por %p1013_p3, %p1012_p2 }
  0x4a   : > { %p1010_p13 = pneg %p1009_p12  ;;  %p1016_p9 = por %p1015_p8, %p1014_p7 }
  0x4c   : > { %p1017_p10 = pnand %p1016_p9, %p1010_p13 }
  0x4e   : > { %1020 = shalt.err (!%p1017_p10)
}
  0x4f   : > { %s1021_s5 = scalar_lea.vmem %s1245_s8, %s1232_s29  ;;  %s1110_s28 = smov [#allocation2]  }
  0x50   : > { %p1022_p1 = scmp.ne.s32.totalorder %s1245_s8, %s1021_s5  ;;  %s1025_s7 = sshll.u32 %s1110_s28, 4  ;;  %s1026_s7 = int_to_ptr.vmem [resolvable:$false] %s1025_s7 }
  0x51   : > { %s1027_s22 = scalar_lea.vmem %s1026_s7, 5120  ;;  %p1028_p11 = scmp.lt.s32.totalorder %s1245_s8, %s1026_s7 }
  0x52   : > { %p1023_p4 = pnand %p1022_p1, %p803_p6  ;;  %p1029_p12 = scmp.lt.s32.totalorder %s1027_s22, %s1021_s5 }
  0x54   : > { %p1024_p5 = pneg %p1023_p4  ;;  %p1030_p2 = por %p1029_p12, %p1028_p11 }
  0x56   : > { %p1031_p3 = pnand %p1030_p2, %p1024_p5 }
  0x58   : > { %1034 = shalt.err (!%p1031_p3)
}
  0x59   : > { %s1111_s9 = smov 128   ;;  %s1112_s10 = smov 8  }
  0x5a   : > { %171 = dma.hbm_to_vmem [thread:$0]  (%p803_p6), %s1243_s11, %s1232_s29, %s1245_s8, %s1235_s6, %s1111_s9, %s1111_s9, %s1112_s10  }
  0x5b PF: > { %p1686_p13 = scmp.ne.s32.totalorder %s1683_s26, 0 }
  0x5c   : > { %s1275_s17 = sand.u32 (!%p1686_p13), 1, %s1097_s13   ;;  %p1687_p7 = scmp.ne.s32.totalorder (!%p1686_p13), %s1680_s23, 0 }
  0x5d   : > { %177 = sbr.rel (%p1686_p13) target bundleno = 581 (0x245), region = 32  ;;  %s180_s20 = scalar_lea.sflag (!%p1686_p13), [#allocation3], %s1275_s17 }
  0x5e   : > { %s856_s19 = smul.u32 (!%p1686_p13), 160, %s1275_s17 }
  0x60   : > { %s1279_s27 = scalar_lea.vmem (!%p1686_p13), [#allocation2], %s856_s19 }
  0x64   : > { %1080 = dma.done.wait (%p1687_p7), %s180_s20, 2560  }
  0x65   : > { %1082 = vsyncadd (%p1687_p7), %s180_s20, 4294964736  ;;  %p1688_p6 = scmp.eq.s32.totalorder %s1158_s16, 0 }
  0x67   : > { %1084 = dma.done.wait (%p1688_p6), [#allocation6], 2048   ;;  %p1689_p8 = pmov %p1688_p6 }
  0x68   : > { %v1113_v0 = vmov 0   ;;  %v915_v1 = vld [vmem:[#allocation5 + $0x4] ss:$8 sps:$4 sm:$0xff]   ;;  %v917_v2 = vld [vmem:[#allocation5] ss:$8 sps:$4 sm:$0xff]   ;;  %v232_v19 = vld [vmem:[%s1279_s27 + $0x50] sm:$0xff]  ;;  %v270_v47 = vlaneseq }
  0x69   : > { %1086 = vsyncadd (%p1689_p8), [#allocation6], 4294965248  ;;  %392 = vmatprep.mubr.bf16.mxu0 %v1113_v0  ;;  %442 = vmatprep.mubr.bf16.mxu1 %v1113_v0  ;;  %v918_v3 = vld [vmem:[#allocation5 + $0x14] ss:$8 sps:$4 sm:$0xff]   ;;  %v920_v4 = vld [vmem:[#allocation5 + $0x10] ss:$8 sps:$4 sm:$0xff]  }
  0x6a   : > { %360 = vmatprep.subr.bf16.mxu0 %v915_v1  ;;  %839 = vmatprep.subr.bf16.mxu1 %v915_v1  ;;  %v921_v5 = vld [vmem:[#allocation5 + $0x24] ss:$8 sps:$4 sm:$0xff]   ;;  %v923_v6 = vld [vmem:[#allocation5 + $0x20] ss:$8 sps:$4 sm:$0xff]   ;;  %v924_v7 = vld [vmem:[#allocation5 + $0x34] ss:$8 sps:$4 sm:$0xff]  }
  0x6b   : > { %361 = vmatpush1.bf16.msra.mxu0 %v917_v2  ;;  %847 = vmatpush1.bf16.msra.mxu1 %v917_v2  ;;  %v926_v8 = vld [vmem:[#allocation5 + $0x30] ss:$8 sps:$4 sm:$0xff]   ;;  %v927_v9 = vld [vmem:[#allocation5 + $0x44] ss:$8 sps:$4 sm:$0xff]   ;;  %v929_v10 = vld [vmem:[#allocation5 + $0x40] ss:$8 sps:$4 sm:$0xff]  }
  0x6c   : > { %362 = vmatprep.subr.bf16.mxu0 %v918_v3  ;;  %840 = vmatprep.subr.bf16.mxu1 %v918_v3  ;;  %v930_v11 = vld [vmem:[#allocation5 + $0x54] ss:$8 sps:$4 sm:$0xff]   ;;  %v932_v12 = vld [vmem:[#allocation5 + $0x50] ss:$8 sps:$4 sm:$0xff]   ;;  %v933_v13 = vld [vmem:[#allocation5 + $0x64] ss:$8 sps:$4 sm:$0xff]  }
  0x6d   : > { %v935_v14 = vld [vmem:[#allocation5 + $0x60] ss:$8 sps:$4 sm:$0xff]   ;;  %v936_v15 = vld [vmem:[#allocation5 + $0x74] ss:$8 sps:$4 sm:$0xff]   ;;  %v938_v16 = vld [vmem:[#allocation5 + $0x70] ss:$8 sps:$4 sm:$0xff]  }
  0x6e   : > { %v222_v17 = vld [vmem:[%s1279_s27] sm:$0xff]  ;;  %v223_v18 = vld [vmem:[%s1279_s27 + $0x8] sm:$0xff]  ;;  %v233_v20 = vld [vmem:[%s1279_s27 + $0x58] sm:$0xff]  ;;  %v271_v48 = vshrl.u32 %v270_v47, 7  ;;  %s857_s29 = smul.u32 320, %s1275_s17  ;;  %s694_s8 = scalar_lea.sflag [#allocation4], %s1275_s17 }
  0x6f   : > { %363 = vmatpush1.bf16.msra.mxu0 %v920_v4  ;;  %848 = vmatpush1.bf16.msra.mxu1 %v920_v4  ;;  %v242_v21 = vpack.c.bf16 %v223_v18, %v222_v17  ;;  %v247_v22 = vpack.c.bf16 %v233_v20, %v232_v19  ;;  %v224_v23 = vld [vmem:[%s1279_s27 + $0x10] sm:$0xff]  ;;  %v225_v24 = vld [vmem:[%s1279_s27 + $0x18] sm:$0xff]  ;;  %v234_v25 = vld [vmem:[%s1279_s27 + $0x60] sm:$0xff]  ;;  %p1690_p9 = scmp.ne.s32.totalorder %s1681_s24, 0 }
  0x70   : > { %364 = vmatprep.subr.bf16.mxu0 %v921_v5  ;;  %841 = vmatprep.subr.bf16.mxu1 %v921_v5  ;;  %v235_v26 = vld [vmem:[%s1279_s27 + $0x68] sm:$0xff]  ;;  %v243_v27 = vpack.c.bf16 %v225_v24, %v224_v23  ;;  %v226_v29 = vld [vmem:[%s1279_s27 + $0x20] sm:$0xff]  ;;  %v236_v31 = vld [vmem:[%s1279_s27 + $0x70] sm:$0xff]  ;;  %v272_v49 = vsub.s32 0, %v271_v48  ;;  %v276_v51 = vsub.s32 1, %v271_v48  ;;  %s1529_s6 = scalar_lea.vmem [#allocation7], %s857_s29 }
  0x71   : > { %v248_v28 = vpack.c.bf16 %v235_v26, %v234_v25  ;;  %v227_v30 = vld [vmem:[%s1279_s27 + $0x28] sm:$0xff]  ;;  %v237_v32 = vld [vmem:[%s1279_s27 + $0x78] sm:$0xff]  ;;  %v228_v35 = vld [vmem:[%s1279_s27 + $0x30] sm:$0xff]  ;;  %s701_s11 = smul.u32 (%p1690_p9), 20, %s1158_s16 }
  0x72   : > { %v244_v33 = vpack.c.bf16 %v227_v30, %v226_v29  ;;  %v249_v34 = vpack.c.bf16 %v237_v32, %v236_v31  ;;  %v229_v36 = vld [vmem:[%s1279_s27 + $0x38] sm:$0xff]  ;;  %v238_v37 = vld [vmem:[%s1279_s27 + $0x80] sm:$0xff]  ;;  %v239_v38 = vld [vmem:[%s1279_s27 + $0x88] sm:$0xff] }
  0x73   : > { %365 = vmatpush1.bf16.msra.mxu0 %v923_v6  ;;  %849 = vmatpush1.bf16.msra.mxu1 %v923_v6  ;;  %v245_v39 = vpack.c.bf16 %v229_v36, %v228_v35  ;;  %v250_v40 = vpack.c.bf16 %v239_v38, %v238_v37  ;;  %v230_v41 = vld [vmem:[%s1279_s27 + $0x40] sm:$0xff]  ;;  %v231_v42 = vld [vmem:[%s1279_s27 + $0x48] sm:$0xff]  ;;  %v240_v43 = vld [vmem:[%s1279_s27 + $0x90] sm:$0xff]  ;;  %s702_s30 = ssub.s32 (%p1690_p9), 38, %s701_s11 }
  0x74   : > { %366 = vmatprep.subr.bf16.mxu0 %v924_v7  ;;  %842 = vmatprep.subr.bf16.mxu1 %v924_v7  ;;  %v241_v44 = vld [vmem:[%s1279_s27 + $0x98] sm:$0xff]  ;;  %v246_v45 = vpack.c.bf16 %v231_v42, %v230_v41  ;;  %v268_v50 = vld [vmem:[%s1674_s2] sm:$0x3]  ;;  %p703_p10 = scmp.lt.s32.totalorder (%p1690_p9), %s702_s30, 20 }
  0x75   : > { %v251_v46 = vpack.c.bf16 %v241_v44, %v240_v43  ;;  %v1322_v52 = vrot.slane %v268_v50, %v272_v49  ;;  %v1324_v53 = vrot.slane %v268_v50, %v276_v51 }
  0x77   : > { %367 = vmatpush1.bf16.msra.mxu0 %v926_v8  ;;  %850 = vmatpush1.bf16.msra.mxu1 %v926_v8 }
  0x78   : > { %368 = vmatprep.subr.bf16.mxu0 %v927_v9  ;;  %843 = vmatprep.subr.bf16.mxu1 %v927_v9 }
  0x7b   : > { %369 = vmatpush1.bf16.msra.mxu0 %v929_v10  ;;  %851 = vmatpush1.bf16.msra.mxu1 %v929_v10 }
  0x7c   : > { %370 = vmatprep.subr.bf16.mxu0 %v930_v11  ;;  %844 = vmatprep.subr.bf16.mxu1 %v930_v11 }
  0x7f   : > { %371 = vmatpush1.bf16.msra.mxu0 %v932_v12  ;;  %852 = vmatpush1.bf16.msra.mxu1 %v932_v12 }
  0x80   : > { %372 = vmatprep.subr.bf16.mxu0 %v933_v13  ;;  %845 = vmatprep.subr.bf16.mxu1 %v933_v13 }
  0x83   : > { %373 = vmatpush1.bf16.msra.mxu0 %v935_v14  ;;  %853 = vmatpush1.bf16.msra.mxu1 %v935_v14 }
  0x84   : > { %374 = vmatprep.subr.bf16.mxu0 %v936_v15  ;;  %846 = vmatprep.subr.bf16.mxu1 %v936_v15 }
  0x87   : > { %375 = vmatpush1.bf16.msra.mxu0 %v938_v16  ;;  %854 = vmatpush1.bf16.msra.mxu1 %v938_v16 }
  0x8a   : > { %393 = vmatmul.mubr.bf16.vlgmr.msra.gmra.mrb[0].mxu0 %v242_v21  ;;  %443 = vmatmul.mubr.bf16.vlgmr.msra.gmra.mrb[0].mxu1 %v247_v22 }
  0x8b   : > { %402 = vmatprep.mubr.bf16.mxu0 %v1113_v0  ;;  %452 = vmatprep.mubr.bf16.mxu1 %v1113_v0 }
  0x92   : > { %403 = vmatmul.mubr.bf16.gmra.mrb[4].mxu0 %v243_v27  ;;  %453 = vmatmul.mubr.bf16.gmra.mrb[4].mxu1 %v248_v28 }
  0x93   : > { %412 = vmatprep.mubr.bf16.mxu0 %v1113_v0  ;;  %462 = vmatprep.mubr.bf16.mxu1 %v1113_v0 }
  0x9a   : > { %413 = vmatmul.mubr.bf16.gmra.mrb[8].mxu0 %v244_v33  ;;  %463 = vmatmul.mubr.bf16.gmra.mrb[8].mxu1 %v249_v34 }
  0x9b   : > { %422 = vmatprep.mubr.bf16.mxu0 %v1113_v0  ;;  %472 = vmatprep.mubr.bf16.mxu1 %v1113_v0 }
  0xa2   : > { %423 = vmatmul.mubr.bf16.gmra.mrb[12].mxu0 %v245_v39  ;;  %473 = vmatmul.mubr.bf16.gmra.mrb[12].mxu1 %v250_v40 }
  0xa3   : > { %432 = vmatprep.mubr.bf16.mxu0 %v1113_v0  ;;  %482 = vmatprep.mubr.bf16.mxu1 %v1113_v0 }
  0xaa   : > { %433 = vmatmul.mubr.bf16.gmra.mrb[16].mxu0 %v246_v45  ;;  %483 = vmatmul.mubr.bf16.gmra.mrb[16].mxu1 %v251_v46 }
 0x15d   : > { %v394_v54 = vpop.f32.mrb[0].mxu0  ;;  %v444_v55 = vpop.f32.mrb[0].mxu1 }
 0x15e   : > { %v1327_v56 = vadd.f32 %v394_v54, %v1322_v52  ;;  %v1330_v57 = vadd.f32 %v444_v55, %v1322_v52  ;;  %v396_v58 = vpop.f32.mrb[1].mxu0  ;;  %v446_v59 = vpop.f32.mrb[1].mxu1 }
 0x15f   : > { %v1333_v60 = vadd.f32 %v396_v58, %v1324_v53  ;;  %v1336_v61 = vadd.f32 %v446_v59, %v1324_v53  ;;  %v398_v62 = vpop.f32.mrb[2].mxu0  ;;  %v448_v63 = vpop.f32.mrb[2].mxu1 }
 0x160   : > { %v1339_v0 = vadd.f32 %v448_v63, %v1322_v52  ;;  %v400_v1 = vpop.f32.mrb[3].mxu0  ;;  %v450_v2 = vpop.f32.mrb[3].mxu1  ;;  %v493_v3 = vmul.f32 %v1327_v56, %v1327_v56  ;;  %v513_v6 = vmul.f32 %v1330_v57, %v1330_v57  ;;  %v1351_v7 = vadd.f32 %v398_v62, %v1322_v52 }
 0x161   : > { %v1344_v4 = vadd.f32 %v450_v2, %v1324_v53  ;;  %v494_v5 = vmul.f32 %v1333_v60, %v1333_v60  ;;  %v514_v9 = vmul.f32 %v1336_v61, %v1336_v61  ;;  %v1358_v10 = vadd.f32 %v400_v1, %v1324_v53 }
 0x162   : > { %v515_v8 = vmul.f32 %v1339_v0, %v1339_v0  ;;  %v495_v16 = vmul.f32 %v1351_v7, %v1351_v7 }
 0x163   : > { %v533_v11 = vadd.f32 %v494_v5, %v493_v3  ;;  %v516_v12 = vmul.f32 %v1344_v4, %v1344_v4  ;;  %v496_v21 = vmul.f32 %v1358_v10, %v1358_v10  ;;  %v563_v25 = vadd.f32 %v514_v9, %v513_v6 }
 0x165   : > { %v404_v13 = vpop.f32.mrb[4].mxu0  ;;  %534 = vadd.xlane.f32.xlu0 %v533_v11  ;;  %v566_v14 = vadd.f32 %v516_v12, %v515_v8  ;;  %v454_v15 = vpop.f32.mrb[4].mxu1  ;;  %v536_v40 = vadd.f32 %v496_v21, %v495_v16 }
 0x166   : > { %v1365_v17 = vadd.f32 %v404_v13, %v1322_v52  ;;  %v406_v18 = vpop.f32.mrb[5].mxu0  ;;  %v1368_v19 = vadd.f32 %v454_v15, %v1322_v52  ;;  %v456_v20 = vpop.f32.mrb[5].mxu1 }
 0x167   : > { %v1373_v22 = vadd.f32 %v406_v18, %v1324_v53  ;;  %567 = vadd.xlane.f32.xlu1 %v566_v14  ;;  %v408_v23 = vpop.f32.mrb[6].mxu0  ;;  %v1376_v24 = vadd.f32 %v456_v20, %v1324_v53  ;;  %v458_v26 = vpop.f32.mrb[6].mxu1 }
 0x168   : > { %v497_v27 = vmul.f32 %v1365_v17, %v1365_v17  ;;  %v1381_v28 = vadd.f32 %v408_v23, %v1322_v52  ;;  %v410_v29 = vpop.f32.mrb[7].mxu0  ;;  %v460_v30 = vpop.f32.mrb[7].mxu1  ;;  %v517_v33 = vmul.f32 %v1368_v19, %v1368_v19  ;;  %v1393_v35 = vadd.f32 %v458_v26, %v1322_v52 }
 0x169   : > { %v498_v31 = vmul.f32 %v1373_v22, %v1373_v22  ;;  %v1386_v32 = vadd.f32 %v410_v29, %v1324_v53  ;;  %v518_v34 = vmul.f32 %v1376_v24, %v1376_v24  ;;  %564 = vadd.xlane.f32.xlu0 %v563_v25  ;;  %v1396_v36 = vadd.f32 %v460_v30, %v1324_v53 }
 0x16a   : > { %v499_v37 = vmul.f32 %v1381_v28, %v1381_v28  ;;  %v519_v44 = vmul.f32 %v1393_v35, %v1393_v35 }
 0x16b   : > { %v500_v38 = vmul.f32 %v1386_v32, %v1386_v32  ;;  %v539_v39 = vadd.f32 %v498_v31, %v497_v27  ;;  %v569_v43 = vadd.f32 %v518_v34, %v517_v33  ;;  %v520_v45 = vmul.f32 %v1396_v36, %v1396_v36 }
 0x16d   : > { %v414_v41 = vpop.f32.mrb[8].mxu0  ;;  %540 = vadd.xlane.f32.xlu1 %v539_v39  ;;  %537 = vadd.xlane.f32.xlu0 %v536_v40  ;;  %v464_v42 = vpop.f32.mrb[8].mxu1  ;;  %v542_v55 = vadd.f32 %v500_v38, %v499_v37  ;;  %v572_v9 = vadd.f32 %v520_v45, %v519_v44 }
 0x16e   : > { %v1407_v46 = vadd.f32 %v414_v41, %v1322_v52  ;;  %v416_v47 = vpop.f32.mrb[9].mxu0  ;;  %v1410_v48 = vadd.f32 %v464_v42, %v1322_v52  ;;  %v466_v49 = vpop.f32.mrb[9].mxu1 }
 0x16f   : > { %v1413_v50 = vadd.f32 %v416_v47, %v1324_v53  ;;  %v418_v51 = vpop.f32.mrb[10].mxu0  ;;  %v1416_v54 = vadd.f32 %v466_v49, %v1324_v53  ;;  %v468_v58 = vpop.f32.mrb[10].mxu1 }
 0x170   : > { %v501_v59 = vmul.f32 %v1407_v46, %v1407_v46  ;;  %v1421_v62 = vadd.f32 %v418_v51, %v1322_v52  ;;  %v420_v63 = vpop.f32.mrb[11].mxu0  ;;  %v521_v1 = vmul.f32 %v1410_v48, %v1410_v48  ;;  %v470_v2 = vpop.f32.mrb[11].mxu1  ;;  %v1433_v8 = vadd.f32 %v468_v58, %v1322_v52 }
 0x171   : > { %v502_v3 = vmul.f32 %v1413_v50, %v1413_v50  ;;  %v1428_v5 = vadd.f32 %v420_v63, %v1324_v53  ;;  %v522_v6 = vmul.f32 %v1416_v54, %v1416_v54  ;;  %543 = vadd.xlane.f32.xlu1 %v542_v55  ;;  %570 = vadd.xlane.f32.xlu0 %v569_v43 }
 0x172   : > { %v503_v11 = vmul.f32 %v1421_v62, %v1421_v62  ;;  %v1440_v13 = vadd.f32 %v470_v2, %v1324_v53  ;;  %v523_v20 = vmul.f32 %v1433_v8, %v1433_v8 }
 0x173   : > { %v504_v12 = vmul.f32 %v1428_v5, %v1428_v5  ;;  %v545_v14 = vadd.f32 %v502_v3, %v501_v59  ;;  %v575_v18 = vadd.f32 %v522_v6, %v521_v1 }
 0x174   : > { %v524_v27 = vmul.f32 %v1440_v13, %v1440_v13 }
 0x175   : > { %v424_v15 = vpop.f32.mrb[12].mxu0  ;;  %573 = vadd.xlane.f32.xlu1 %v572_v9  ;;  %546 = vadd.xlane.f32.xlu0 %v545_v14  ;;  %v474_v16 = vpop.f32.mrb[12].mxu1  ;;  %v548_v33 = vadd.f32 %v504_v12, %v503_v11 }
 0x176   : > { %v1445_v21 = vadd.f32 %v424_v15, %v1322_v52  ;;  %v426_v23 = vpop.f32.mrb[13].mxu0  ;;  %v1448_v25 = vadd.f32 %v474_v16, %v1322_v52  ;;  %v476_v26 = vpop.f32.mrb[13].mxu1  ;;  %v578_v55 = vadd.f32 %v524_v27, %v523_v20 }
 0x177   : > { %v1453_v29 = vadd.f32 %v426_v23, %v1324_v53  ;;  %v428_v30 = vpop.f32.mrb[14].mxu0  ;;  %v1456_v31 = vadd.f32 %v476_v26, %v1324_v53  ;;  %v478_v34 = vpop.f32.mrb[14].mxu1 }
 0x178   : > { %v505_v37 = vmul.f32 %v1445_v21, %v1445_v21  ;;  %v1461_v38 = vadd.f32 %v428_v30, %v1322_v52  ;;  %v430_v39 = vpop.f32.mrb[15].mxu0  ;;  %v525_v40 = vmul.f32 %v1448_v25, %v1448_v25  ;;  %v480_v41 = vpop.f32.mrb[15].mxu1  ;;  %v1473_v45 = vadd.f32 %v478_v34, %v1322_v52 }
 0x179   : > { %v506_v42 = vmul.f32 %v1453_v29, %v1453_v29  ;;  %v1468_v43 = vadd.f32 %v430_v39, %v1324_v53  ;;  %v526_v44 = vmul.f32 %v1456_v31, %v1456_v31  ;;  %549 = vadd.xlane.f32.xlu1 %v548_v33  ;;  %576 = vadd.xlane.f32.xlu0 %v575_v18 }
 0x17a   : > { %v1476_v47 = vadd.f32 %v480_v41, %v1324_v53  ;;  %v507_v49 = vmul.f32 %v1461_v38, %v1461_v38  ;;  %v527_v2 = vmul.f32 %v1473_v45, %v1473_v45 }
 0x17b   : > { %v508_v51 = vmul.f32 %v1468_v43, %v1468_v43  ;;  %v551_v58 = vadd.f32 %v506_v42, %v505_v37  ;;  %v581_v1 = vadd.f32 %v526_v44, %v525_v40 }
 0x17c   : > { %v528_v3 = vmul.f32 %v1476_v47, %v1476_v47 }
 0x17d   : > { %v434_v59 = vpop.f32.mrb[16].mxu0  ;;  %579 = vadd.xlane.f32.xlu1 %v578_v55  ;;  %552 = vadd.xlane.f32.xlu0 %v551_v58  ;;  %v484_v63 = vpop.f32.mrb[16].mxu1  ;;  %v554_v18 = vadd.f32 %v508_v51, %v507_v49 }
 0x17e   : > { %v1487_v6 = vadd.f32 %v434_v59, %v1322_v52  ;;  %v436_v9 = vpop.f32.mrb[17].mxu0  ;;  %v1490_v11 = vadd.f32 %v484_v63, %v1322_v52  ;;  %v486_v12 = vpop.f32.mrb[17].mxu1  ;;  %v584_v41 = vadd.f32 %v528_v3, %v527_v2 }
 0x17f   : > { %v1493_v14 = vadd.f32 %v436_v9, %v1324_v53  ;;  %v438_v15 = vpop.f32.mrb[18].mxu0  ;;  %v1496_v16 = vadd.f32 %v486_v12, %v1324_v53  ;;  %v488_v20 = vpop.f32.mrb[18].mxu1 }
 0x180   : > { %v509_v23 = vmul.f32 %v1487_v6, %v1487_v6  ;;  %v1501_v26 = vadd.f32 %v438_v15, %v1322_v52  ;;  %v440_v27 = vpop.f32.mrb[19].mxu0  ;;  %v529_v30 = vmul.f32 %v1490_v11, %v1490_v11  ;;  %v490_v33 = vpop.f32.mrb[19].mxu1  ;;  %v1513_v40 = vadd.f32 %v488_v20, %v1322_v52 }
 0x181   : > { %v510_v34 = vmul.f32 %v1493_v14, %v1493_v14  ;;  %v1508_v37 = vadd.f32 %v440_v27, %v1324_v53  ;;  %v530_v39 = vmul.f32 %v1496_v16, %v1496_v16  ;;  %555 = vadd.xlane.f32.xlu1 %v554_v18  ;;  %582 = vadd.xlane.f32.xlu0 %v581_v1 }
 0x182   : > { %v511_v42 = vmul.f32 %v1501_v26, %v1501_v26  ;;  %v1520_v49 = vadd.f32 %v490_v33, %v1324_v53  ;;  %v531_v58 = vmul.f32 %v1513_v40, %v1513_v40 }
 0x183   : > { %v512_v44 = vmul.f32 %v1508_v37, %v1508_v37  ;;  %v557_v51 = vadd.f32 %v510_v34, %v509_v23  ;;  %v587_v55 = vadd.f32 %v530_v39, %v529_v30 }
 0x184   : > { %v532_v52 = vmul.f32 %v1520_v49, %v1520_v49 }
 0x185   : > { %585 = vadd.xlane.f32.xlu1 %v584_v41  ;;  %558 = vadd.xlane.f32.xlu0 %v557_v51  ;;  %v560_v59 = vadd.f32 %v512_v44, %v511_v42 }
 0x186   : > { %v590_v63 = vadd.f32 %v532_v52, %v531_v58 }
 0x189   : > { %561 = vadd.xlane.f32.xlu1 %v560_v59  ;;  %588 = vadd.xlane.f32.xlu0 %v587_v55 }
 0x18d   : > { %591 = vadd.xlane.f32.xlu1 %v590_v63 }
 0x1f2   : > { %v535_v1 = vpop.xlane.xlu0 %534 }
 0x1f3   : > { %939 = vrsqrt.f32 %v535_v1 }
 0x1f4   : > { %v568_v53 = vpop.xlane.xlu1 %567 }
 0x1f5   : > { %941 = vrsqrt.f32 %v568_v53 }
 0x1f6   : > { %v565_v2 = vpop.xlane.xlu0 %564 }
 0x1f7   : > { %943 = vrsqrt.f32 %v565_v2 }
 0x1fa   : > { %v541_v3 = vpop.xlane.xlu1 %540  ;;  %v538_v9 = vpop.xlane.xlu0 %537 }
 0x1fb   : > { %945 = vrsqrt.f32 %v541_v3 }
 0x1fc   : > { %947 = vrsqrt.f32 %v538_v9 }
 0x1fd   : > { %v940_v12 = vpop.eup %939 }
 0x1fe   : > { %v613_v15 = vmul.f32 %v940_v12, %v1327_v56  ;;  %v614_v18 = vmul.f32 %v940_v12, %v1333_v60  ;;  %v544_v20 = vpop.xlane.xlu1 %543  ;;  %v571_v23 = vpop.xlane.xlu0 %570 }
 0x1ff   : > { %v942_v27 = vpop.eup %941  ;;  %949 = vrsqrt.f32 %v544_v20 }
 0x200   : > { %653 = vst [vmem:[%s1529_s6] sm:$0xff] %v613_v15  ;;  %654 = vst [vmem:[%s1529_s6 + $0x8] sm:$0xff] %v614_v18  ;;  %v635_v30 = vmul.f32 %v942_v27, %v1339_v0  ;;  %v636_v56 = vmul.f32 %v942_v27, %v1344_v4  ;;  %951 = vrsqrt.f32 %v571_v23 }
 0x201   : > { %v944_v60 = vpop.eup %943 }
 0x202   : > { %675 = vst [vmem:[%s1529_s6 + $0xb0] sm:$0xff] %v635_v30  ;;  %676 = vst [vmem:[%s1529_s6 + $0xb8] sm:$0xff] %v636_v56  ;;  %v633_v33 = vmul.f32 %v944_v60, %v1330_v57  ;;  %v634_v34 = vmul.f32 %v944_v60, %v1336_v61  ;;  %v574_v39 = vpop.xlane.xlu1 %573  ;;  %v547_v41 = vpop.xlane.xlu0 %546 }
 0x203   : > { %953 = vrsqrt.f32 %v574_v39 }
 0x204   : > { %673 = vst [vmem:[%s1529_s6 + $0xa0] sm:$0xff] %v633_v33  ;;  %674 = vst [vmem:[%s1529_s6 + $0xa8] sm:$0xff] %v634_v34  ;;  %955 = vrsqrt.f32 %v547_v41 }
 0x205   : > { %v946_v0 = vpop.eup %945 }
 0x206   : > { %v948_v4 = vpop.eup %947  ;;  %v617_v42 = vmul.f32 %v946_v0, %v1365_v17  ;;  %v618_v44 = vmul.f32 %v946_v0, %v1373_v22  ;;  %v550_v51 = vpop.xlane.xlu1 %549 }
 0x207   : > { %v577_v57 = vpop.xlane.xlu0 %576  ;;  %v615_v61 = vmul.f32 %v948_v4, %v1351_v7  ;;  %v616_v55 = vmul.f32 %v948_v4, %v1358_v10  ;;  %957 = vrsqrt.f32 %v550_v51 }
 0x208   : > { %657 = vst [vmem:[%s1529_s6 + $0x20] sm:$0xff] %v617_v42  ;;  %658 = vst [vmem:[%s1529_s6 + $0x28] sm:$0xff] %v618_v44  ;;  %959 = vrsqrt.f32 %v577_v57 }
 0x209   : > { %v950_v58 = vpop.eup %949  ;;  %655 = vst [vmem:[%s1529_s6 + $0x10] sm:$0xff] %v615_v61  ;;  %656 = vst [vmem:[%s1529_s6 + $0x18] sm:$0xff] %v616_v55 }
 0x20a   : > { %v952_v17 = vpop.eup %951  ;;  %v619_v22 = vmul.f32 %v950_v58, %v1381_v28  ;;  %v620_v52 = vmul.f32 %v950_v58, %v1386_v32  ;;  %v580_v59 = vpop.xlane.xlu1 %579 }
 0x20b   : > { %v553_v7 = vpop.xlane.xlu0 %552  ;;  %v637_v10 = vmul.f32 %v952_v17, %v1368_v19  ;;  %v638_v63 = vmul.f32 %v952_v17, %v1376_v24  ;;  %961 = vrsqrt.f32 %v580_v59 }
 0x20c   : > { %659 = vst [vmem:[%s1529_s6 + $0x30] sm:$0xff] %v619_v22  ;;  %660 = vst [vmem:[%s1529_s6 + $0x38] sm:$0xff] %v620_v52  ;;  %963 = vrsqrt.f32 %v553_v7 }
 0x20d   : > { %v954_v1 = vpop.eup %953  ;;  %677 = vst [vmem:[%s1529_s6 + $0xc0] sm:$0xff] %v637_v10  ;;  %678 = vst [vmem:[%s1529_s6 + $0xc8] sm:$0xff] %v638_v63 }
 0x20e   : > { %v956_v28 = vpop.eup %955  ;;  %v639_v32 = vmul.f32 %v954_v1, %v1393_v35  ;;  %v640_v53 = vmul.f32 %v954_v1, %v1396_v36  ;;  %v556_v2 = vpop.xlane.xlu1 %555 }
 0x20f   : > { %v583_v19 = vpop.xlane.xlu0 %582  ;;  %v621_v24 = vmul.f32 %v956_v28, %v1407_v46  ;;  %v622_v3 = vmul.f32 %v956_v28, %v1413_v50  ;;  %965 = vrsqrt.f32 %v556_v2 }
 0x210   : > { %679 = vst [vmem:[%s1529_s6 + $0xd0] sm:$0xff] %v639_v32  ;;  %680 = vst [vmem:[%s1529_s6 + $0xd8] sm:$0xff] %v640_v53  ;;  %967 = vrsqrt.f32 %v583_v19 }
 0x211   : > { %v958_v9 = vpop.eup %957  ;;  %661 = vst [vmem:[%s1529_s6 + $0x40] sm:$0xff] %v621_v24  ;;  %662 = vst [vmem:[%s1529_s6 + $0x48] sm:$0xff] %v622_v3 }
 0x212   : > { %v960_v35 = vpop.eup %959  ;;  %v623_v36 = vmul.f32 %v958_v9, %v1421_v62  ;;  %v624_v12 = vmul.f32 %v958_v9, %v1428_v5  ;;  %v586_v15 = vpop.xlane.xlu1 %585 }
 0x213   : > { %v559_v46 = vpop.xlane.xlu0 %558  ;;  %v641_v50 = vmul.f32 %v960_v35, %v1410_v48  ;;  %v642_v18 = vmul.f32 %v960_v35, %v1416_v54  ;;  %969 = vrsqrt.f32 %v586_v15 }
 0x214   : > { %663 = vst [vmem:[%s1529_s6 + $0x50] sm:$0xff] %v623_v36  ;;  %664 = vst [vmem:[%s1529_s6 + $0x58] sm:$0xff] %v624_v12  ;;  %971 = vrsqrt.f32 %v559_v46 }
 0x215   : > { %v962_v20 = vpop.eup %961  ;;  %681 = vst [vmem:[%s1529_s6 + $0xe0] sm:$0xff] %v641_v50  ;;  %682 = vst [vmem:[%s1529_s6 + $0xe8] sm:$0xff] %v642_v18 }
 0x216   : > { %v964_v62 = vpop.eup %963  ;;  %v643_v5 = vmul.f32 %v962_v20, %v1433_v8  ;;  %v644_v23 = vmul.f32 %v962_v20, %v1440_v13  ;;  %v562_v27 = vpop.xlane.xlu1 %561 }
 0x217   : > { %v589_v48 = vpop.xlane.xlu0 %588  ;;  %v625_v54 = vmul.f32 %v964_v62, %v1445_v21  ;;  %v626_v30 = vmul.f32 %v964_v62, %v1453_v29  ;;  %973 = vrsqrt.f32 %v562_v27 }
 0x218   : > { %683 = vst [vmem:[%s1529_s6 + $0xf0] sm:$0xff] %v643_v5  ;;  %684 = vst [vmem:[%s1529_s6 + $0xf8] sm:$0xff] %v644_v23  ;;  %975 = vrsqrt.f32 %v589_v48 }
 0x219   : > { %v966_v56 = vpop.eup %965  ;;  %665 = vst [vmem:[%s1529_s6 + $0x60] sm:$0xff] %v625_v54  ;;  %666 = vst [vmem:[%s1529_s6 + $0x68] sm:$0xff] %v626_v30 }
 0x21a   : > { %v968_v8 = vpop.eup %967  ;;  %v627_v13 = vmul.f32 %v966_v56, %v1461_v38  ;;  %v628_v60 = vmul.f32 %v966_v56, %v1468_v43  ;;  %v592_v21 = vpop.xlane.xlu1 %591 }
 0x21b   : > { %v645_v29 = vmul.f32 %v968_v8, %v1448_v25  ;;  %v646_v33 = vmul.f32 %v968_v8, %v1456_v31  ;;  %977 = vrsqrt.f32 %v592_v21 }
 0x21c   : > { %667 = vst [vmem:[%s1529_s6 + $0x70] sm:$0xff] %v627_v13  ;;  %668 = vst [vmem:[%s1529_s6 + $0x78] sm:$0xff] %v628_v60 }
 0x21d   : > { %v970_v34 = vpop.eup %969  ;;  %685 = vst [vmem:[%s1529_s6 + $0x100] sm:$0xff] %v645_v29  ;;  %686 = vst [vmem:[%s1529_s6 + $0x108] sm:$0xff] %v646_v33 }
 0x21e   : > { %v972_v39 = vpop.eup %971  ;;  %v647_v38 = vmul.f32 %v970_v34, %v1473_v45  ;;  %v648_v43 = vmul.f32 %v970_v34, %v1476_v47 }
 0x21f   : > { %v629_v25 = vmul.f32 %v972_v39, %v1487_v6  ;;  %v630_v31 = vmul.f32 %v972_v39, %v1493_v14 }
 0x220   : > { %687 = vst [vmem:[%s1529_s6 + $0x110] sm:$0xff] %v647_v38  ;;  %688 = vst [vmem:[%s1529_s6 + $0x118] sm:$0xff] %v648_v43 }
 0x221   : > { %v974_v41 = vpop.eup %973  ;;  %669 = vst [vmem:[%s1529_s6 + $0x80] sm:$0xff] %v629_v25  ;;  %670 = vst [vmem:[%s1529_s6 + $0x88] sm:$0xff] %v630_v31 }
 0x222   : > { %v976_v0 = vpop.eup %975  ;;  %v631_v4 = vmul.f32 %v974_v41, %v1501_v26  ;;  %v632_v45 = vmul.f32 %v974_v41, %v1508_v37  ;;  %700 = sbr.rel (!%p1690_p9) target bundleno = 581 (0x245), region = 44 }
 0x223   : > { %v649_v47 = vmul.f32 %v976_v0, %v1490_v11  ;;  %v650_v6 = vmul.f32 %v976_v0, %v1496_v16 }
 0x224   : > { %671 = vst [vmem:[%s1529_s6 + $0x90] sm:$0xff] %v631_v4  ;;  %672 = vst [vmem:[%s1529_s6 + $0x98] sm:$0xff] %v632_v45 }
 0x225   : > { %v978_v14 = vpop.eup %977  ;;  %689 = vst [vmem:[%s1529_s6 + $0x120] sm:$0xff] %v649_v47  ;;  %690 = vst [vmem:[%s1529_s6 + $0x128] sm:$0xff] %v650_v6 }
 0x226   : > { %v651_v42 = vmul.f32 %v978_v14, %v1513_v40  ;;  %v652_v44 = vmul.f32 %v978_v14, %v1520_v49 }
 0x228   : > { %691 = vst [vmem:[%s1529_s6 + $0x130] sm:$0xff] %v651_v42  ;;  %692 = vst [vmem:[%s1529_s6 + $0x138] sm:$0xff] %v652_v44 }
 0x229   : > { %s1699_s30 = smov (!%p703_p10, %s702_s30), 20 }
 0x22a   : > { %s1613_s4 = sshll.u32 %s1699_s30, 8 }
 0x22b   : > { %s708_s5 = ssub.s32 5120, %s1613_s4 }
 0x22c   : > { %709 = vsyncadd %s694_s8, %s708_s5  ;;  %p827_p1 = scmp.ne.s32.totalorder %s1613_s4, 0  ;;  %s838_s24 = smul.u32 5120, %s1158_s16 }
 0x22d   : > { %s715_s28 = sshll.u32 %s1529_s6, 4  ;;  %s1114_s19 = smov [#allocation7]   ;;  %s1626_s28 = int_to_ptr.vmem [resolvable:$true] %s715_s28 }
 0x22e   : > { %s1624_s9 = scalar_lea.hbm %s1675_s3, %s838_s24  ;;  %s1035_s10 = scalar_lea.vmem %s1626_s28, %s1613_s4 }
 0x22f   : > { %p1036_p4 = scmp.ne.s32.totalorder %s1626_s28, %s1035_s10  ;;  %s1039_s20 = sshll.u32 %s1114_s19, 4  ;;  %s1040_s20 = int_to_ptr.vmem [resolvable:$false] %s1039_s20 }
 0x230   : > { %s1041_s16 = scalar_lea.vmem %s1040_s20, 10240  ;;  %p1042_p12 = scmp.lt.s32.totalorder %s1626_s28, %s1040_s20 }
 0x231   : > { %p1037_p5 = pnand %p1036_p4, %p827_p1  ;;  %p1043_p2 = scmp.lt.s32.totalorder %s1041_s16, %s1035_s10 }
 0x233   : > { %p1038_p11 = pneg %p1037_p5  ;;  %p1044_p3 = por %p1043_p2, %p1042_p12 }
 0x235   : > { %p1045_p13 = pnand %p1044_p3, %p1038_p11 }
 0x237   : > { %1048 = shalt.err (!%p1045_p13)
}
 0x238   : > { %s1049_s27 = scalar_lea.hbm %s1624_s9, %s1613_s4  ;;  %s1053_s29 = scalar_lea.hbm %s1675_s3, 9728 }
 0x239   : > { %p1050_p7 = scmp.ne.s32.totalorder %s1624_s9, %s1049_s27  ;;  %p1054_p9 = scmp.lt.u32.totalorder %s1624_s9, %s1675_s3 }
 0x23a   : > { %p1055_p10 = scmp.lt.u32.totalorder %s1053_s29, %s1049_s27  ;;  %p1057_p5 = scmp.lt.u32.totalorder %s1049_s27, %s1624_s9 }
 0x23b   : > { %p1051_p6 = pnand %p1050_p7, %p827_p1 }
 0x23c   : > { %p1056_p4 = por %p1055_p10, %p1054_p9 }
 0x23d   : > { %p1052_p8 = pneg %p1051_p6 }
 0x23e   : > { %p1058_p11 = por %p1057_p5, %p1056_p4 }
 0x240   : > { %p1059_p12 = pnand %p1058_p11, %p1052_p8 }
 0x242   : > { %1062 = shalt.err (!%p1059_p12)
}
 0x243   : > { %s1115_s30 = smov 256   ;;  %s1116_s5 = smov 16  }
 0x244   : > { %721 = dma.vmem_to_hbm [thread:$0]  (%p827_p1), %s1626_s28, %s1613_s4, %s1624_s9, %s694_s8, %s1115_s30, %s1115_s30, %s1116_s5  }
 0x245 PF: > { %s730_s24 = sand.u32 1, %s1093_s12   ;;  %p1691_p2 = scmp.ne.s32.totalorder %s1682_s25, 0 }
 0x246   : > { %s731_s7 = scalar_lea.sflag [#allocation4], %s730_s24 }
 0x247   : > { %p869_p3 = pnand %p801_p0, %p1691_p2 }
 0x249   : > { %1088 = dma.done.wait (!%p869_p3), %s731_s7, 5120  }
 0x24a   : > { %1090 = vsyncadd (!%p869_p3), %s731_s7, 4294962176  ;;  %p17_p13 = scmp.ge.s32.totalorder %s1162_s18, 4   ;;  %s1692_s12 = smov %s1097_s13 }
 0x24b   : > { %s1693_s13 = smov %s1101_s14  ;;  %s1694_s14 = smov %s1174_s21 }
 0x24c   : > { %s1695_s15 = smov %s1162_s18  ;;  %19 = sbr.rel (!%p17_p13) target bundleno = 6 (0x6), region = 81 }
 0x253   :  { %736 = vsyncpa [#allocation3], 1 }
 0x254   :  { %738 = vsyncpa [#allocation3 + $0x1], 1 }
 0x255   :  { %739 = vsyncpa [#allocation6], 1 }
 0x256   :  { %740 = vsyncpa [#allocation4], 1 }
 0x257   :  { %742 = vsyncpa [#allocation4 + $0x1], 1 }

</bundles_post_ra>
